<compile_context>
chip_gen: v7x
topology: tpu7x:2x2x1
jax: 0.10.0
libtpu: 0.0.40
codegen_flags: <defaults>
</compile_context>

<pallas_src>
import math
from functools import partial

import jax
import jax.numpy as jnp
from jax import lax
from jax.experimental import pallas as pl
from jax.experimental.pallas import tpu as pltpu


def _round_up(a: int, b: int) -> int:
    return (a + b - 1) // b * b


def _cdiv(a: int, b: int) -> int:
    return (a + b - 1) // b


# --------------------------------------------------------------------------- #
# Kernel
# --------------------------------------------------------------------------- #
def _spectrogram_kernel(body_ref, tail_ref, cos_ref, sin_ref, out_ref, *,
                        n_fft: int, hop: int, ov: int, even: bool):
    """One (batch, frame-tile) grid step.

    body_ref: (1, TM, hop)    bf16  TM hop-rows of the padded signal
    tail_ref: (1, 1, ov, hop) bf16  next ov hop-rows (frame overlap)
    cos_ref : (F, n_fft)      bf16  win*cos basis, rows = bins 0..F-1
    sin_ref : (F, n_fft)      bf16  win*sin basis; row 0 = win*(-1)^k (Nyquist)
    out_ref : (1, n_freq, TM) f32   power, frequency-major (transposed) tile
    """
    body = body_ref[0]            # (TM, hop)
    tail = tail_ref[0, 0]         # (ov, hop)
    tm = body.shape[0]

    # Frame r, column j*hop + q  ==  span[r + j, q].  Build the (TM, n_fft)
    # frame tile with ov static slices + one lane-concat (no gather, no
    # per-row dynamic slicing).
    span = jnp.concatenate([body, tail], axis=0)          # (TM + ov, hop)
    cols = [span[j:j + tm, :] for j in range(ov)]
    frames = cols[0] if ov == 1 else jnp.concatenate(cols, axis=1)
    if ov * hop != n_fft:
        frames = frames[:, :n_fft]                         # (TM, n_fft)

    # Two MXU passes (cos, sin), contracted on the n_fft axis of both
    # operands so the result is already frequency-major: (F, TM) f32.
    dn = (((1,), (1,)), ((), ()))
    c = lax.dot_general(cos_ref[...], frames, dn,
                        preferred_element_type=jnp.float32)
    s = lax.dot_general(sin_ref[...], frames, dn,
                        preferred_element_type=jnp.float32)
    cc = c * c
    ss = s * s

    if even:
        # bin 0 has zero imaginary part (its sin row was recycled to carry the
        # Nyquist vector), bin F = n_fft/2 has zero imaginary part too.
        mid = cc + ss
        pieces = [cc[0:1]]
        if mid.shape[0] > 1:
            pieces.append(mid[1:])
        pieces.append(ss[0:1])                 # Nyquist power
        out = jnp.concatenate(pieces, axis=0)  # (n_freq, TM)
    else:
        out = cc + ss                          # odd n_fft: F == n_freq
    out_ref[0, :, :] = out


# --------------------------------------------------------------------------- #
# Glue helpers
# --------------------------------------------------------------------------- #
_BASIS_CACHE: dict = {}


def _dft_basis(n_fft: int, dtype):
    """Window-folded real-DFT basis, cached across calls."""
    key = (n_fft, jnp.dtype(dtype).name)
    if key in _BASIS_CACHE:
        return _BASIS_CACHE[key]
    even = n_fft % 2 == 0
    F = n_fft // 2 if even else n_fft // 2 + 1
    k = jnp.arange(n_fft, dtype=jnp.float32)
    win = 0.5 - 0.5 * jnp.cos(2.0 * math.pi * k / n_fft)       # periodic Hann
    ki = jnp.arange(n_fft, dtype=jnp.int32)
    fi = jnp.arange(F, dtype=jnp.int32)
    phase = (fi[:, None] * ki[None, :]) % n_fft                # exact int phase
    ang = (2.0 * math.pi / n_fft) * phase.astype(jnp.float32)
    cosT = win[None, :] * jnp.cos(ang)                         # (F, n_fft)
    sinT = win[None, :] * jnp.sin(ang)
    if even:
        # sin row 0 is identically zero -> reuse it for the Nyquist bin.
        nyq = win * jnp.where(ki % 2 == 0, 1.0, -1.0)
        sinT = sinT.at[0].set(nyq)
    cosT = cosT.astype(dtype)
    sinT = sinT.astype(dtype)
    _BASIS_CACHE[key] = (cosT, sinT)
    return cosT, sinT


def _pick_tm(n_frames: int, n_fft: int) -> int:
    """MXU-aligned frames-per-tile; fat tiles for small n_fft, smaller for big."""
    if n_fft <= 1024:
        cap = 1024
    elif n_fft <= 2048:
        cap = 512
    else:
        cap = 256
    if n_frames <= 128:
        return 128
    return min(cap, _round_up(n_frames, 256))


def _vmem_limit_bytes() -> int:
    """~75% of the physical per-core VMEM (128 MiB v5e/v6e, 64 MiB v7x)."""
    try:
        cap = int(pltpu.get_tpu_info().vmem_capacity_bytes)
    except Exception:
        cap = 64 * 2**20
    return max(32 * 2**20, int(0.75 * cap))


# --------------------------------------------------------------------------- #
# Public wrapper
# --------------------------------------------------------------------------- #
def spectrogram(x: jax.Array, n_fft: int, hop_length: int,
                compute_dtype=jnp.bfloat16) -> jax.Array:
    """x: (B, L) or (L,) float32 -> (B, n_fft//2 + 1, n_frames) float32 power."""
    squeeze = x.ndim == 1
    if squeeze:
        x = x[None, :]
    x = jnp.asarray(x, jnp.float32)
    B, _ = x.shape
    hop = int(hop_length)
    n_freq = n_fft // 2 + 1
    even = n_fft % 2 == 0
    F = n_fft // 2 if even else n_freq

    # center=True reflect padding (torch.stft default)
    pad = n_fft // 2
    xp = jnp.pad(x, ((0, 0), (pad, pad)), mode="reflect")
    Lp = xp.shape[1]
    n_frames = 1 + (Lp - n_fft) // hop

    ov = _cdiv(n_fft, hop)               # hop-rows of overlap beyond a tile
    TM = _pick_tm(n_frames, n_fft)       # frames per grid step
    n_tiles = _cdiv(n_frames, TM)
    T_pad = n_tiles * TM
    R_pad = T_pad + ov                   # hop-rows of padded signal indexed

    # Contiguous signal viewed as hop-sample rows (free reshape); the kernel
    # rebuilds frames from this, so the signal is streamed from HBM ~once.
    xp = jnp.pad(xp, ((0, 0), (0, R_pad * hop - Lp)))
    xp_r = xp.astype(compute_dtype).reshape(B, R_pad, hop)

    # Tiny per-tile overlap tails: rows [(i+1)*TM, (i+1)*TM + ov).
    tail_idx = (jnp.arange(n_tiles) + 1)[:, None] * TM + jnp.arange(ov)[None, :]
    tails = xp_r[:, tail_idx, :]                     # (B, n_tiles, ov, hop)

    cosT, sinT = _dft_basis(n_fft, compute_dtype)    # (F, n_fft) each, cached

    bs = jnp.dtype(compute_dtype).itemsize
    cost = pl.CostEstimate(
        flops=2 * 2 * F * n_fft * B * T_pad,
        transcendentals=0,
        bytes_accessed=(B * R_pad * hop * bs + B * n_tiles * ov * hop * bs
                        + 2 * F * n_fft * bs + B * n_freq * T_pad * 4),
    )

    kernel = partial(_spectrogram_kernel, n_fft=n_fft, hop=hop, ov=ov, even=even)
    out = pl.pallas_call(
        kernel,
        out_shape=jax.ShapeDtypeStruct((B, n_freq, T_pad), jnp.float32),
        grid=(B, n_tiles),
        in_specs=[
            pl.BlockSpec((1, TM, hop), lambda b, i: (b, i, 0)),        # signal rows
            pl.BlockSpec((1, 1, ov, hop), lambda b, i: (b, i, 0, 0)),  # overlap tail
            pl.BlockSpec((F, n_fft), lambda b, i: (0, 0)),             # resident cos
            pl.BlockSpec((F, n_fft), lambda b, i: (0, 0)),             # resident sin
        ],
        out_specs=pl.BlockSpec((1, n_freq, TM), lambda b, i: (b, 0, i)),
        compiler_params=pltpu.CompilerParams(
            dimension_semantics=("parallel", "parallel"),
            vmem_limit_bytes=_vmem_limit_bytes(),
        ),
        cost_estimate=cost,
    )(xp_r, tails, cosT, sinT)

    if T_pad != n_frames:
        out = out[:, :, :n_frames]
    return out[0] if squeeze else out


# --------------------------------------------------------------------------- #
# Pure-JAX reference (rfft) for correctness check
# --------------------------------------------------------------------------- #
def _reference_spectrogram(x, n_fft, hop_length):
    x = jnp.asarray(x, jnp.float32)
    pad = n_fft // 2
    xp = jnp.pad(x, ((0, 0), (pad, pad)), mode="reflect")
    n_frames = 1 + (xp.shape[1] - n_fft) // hop_length
    idx = jnp.arange(n_frames)[:, None] * hop_length + jnp.arange(n_fft)[None, :]
    frames = xp[:, idx]                                    # (B, T, n_fft)
    k = jnp.arange(n_fft, dtype=jnp.float32)
    win = 0.5 - 0.5 * jnp.cos(2.0 * math.pi * k / n_fft)
    X = jnp.fft.rfft(frames * win, n=n_fft, axis=-1)       # (B, T, n_freq)
    return (jnp.abs(X) ** 2).astype(jnp.float32).transpose(0, 2, 1)


if __name__ == "__main__":
    n_fft = 16
    hop_length = 4
    B, L = 2, 64

    key = jax.random.PRNGKey(0)
    x = jax.random.normal(key, (B, L), dtype=jnp.float32)

    out = jax.block_until_ready(spectrogram(x, n_fft, hop_length))
    ref = _reference_spectrogram(x, n_fft, hop_length)

    assert out.shape == (B, n_fft // 2 + 1, 1 + L // hop_length), out.shape
    scale = float(jnp.max(ref))
    # bf16 MXU inputs with f32 accumulation -> tolerance scaled to spectrum peak
    assert jnp.allclose(out, ref, rtol=5e-2, atol=5e-2 * scale), \
        float(jnp.max(jnp.abs(out - ref)))

    print("KERNEL_OK")
</pallas_src>

<mosaic_0001>
module attributes {stable_mosaic.version = 11 : i64} {
  func.func @_spectrogram_kernel(%arg0: i32, %arg1: i32, %arg2: memref<1x128x4xbf16, #tpu.memory_space<vmem>>, %arg3: memref<1x1x4x4xbf16, #tpu.memory_space<vmem>>, %arg4: memref<8x16xbf16, #tpu.memory_space<vmem>>, %arg5: memref<8x16xbf16, #tpu.memory_space<vmem>>, %arg6: memref<1x9x128xf32, #tpu.memory_space<vmem>>) attributes {dimension_semantics = [#tpu.dimension_semantics<parallel>, #tpu.dimension_semantics<parallel>], iteration_bounds = array<i64: 2, 1>, scalar_prefetch = 0 : i64, scratch_operands = 0 : i64, tpu.core_type = #tpu.core_type<tc>, window_params = [{transform_indices = @transform_0, window_bounds = array<i64: 1, 128, 4>}, {transform_indices = @transform_1, window_bounds = array<i64: 1, 1, 4, 4>}, {pipeline_mode = #tpu.pipeline_mode<synchronous>, transform_indices = @transform_2, window_bounds = array<i64: 8, 16>}, {pipeline_mode = #tpu.pipeline_mode<synchronous>, transform_indices = @transform_3, window_bounds = array<i64: 8, 16>}, {transform_indices = @transform_4, window_bounds = array<i64: 1, 9, 128>}]} {
    %c0 = arith.constant 0 : index
    %c0_0 = arith.constant 0 : index
    %c0_1 = arith.constant 0 : index
    %0 = vector.load %arg2[%c0, %c0_0, %c0_1] : memref<1x128x4xbf16, #tpu.memory_space<vmem>>, vector<1x128x4xbf16>
    %1 = vector.shape_cast %0 : vector<1x128x4xbf16> to vector<128x4xbf16>
    %c0_2 = arith.constant 0 : index
    %c0_3 = arith.constant 0 : index
    %c0_4 = arith.constant 0 : index
    %c0_5 = arith.constant 0 : index
    %2 = vector.load %arg3[%c0_2, %c0_3, %c0_4, %c0_5] : memref<1x1x4x4xbf16, #tpu.memory_space<vmem>>, vector<1x1x4x4xbf16>
    %3 = vector.shape_cast %2 : vector<1x1x4x4xbf16> to vector<4x4xbf16>
    %4 = tpu.concatenate %1, %3 in 0 : vector<128x4xbf16>, vector<4x4xbf16> -> vector<132x4xbf16>
    %5 = vector.extract_strided_slice %4 {offsets = [0, 0], sizes = [128, 4], strides = [1, 1]} : vector<132x4xbf16> to vector<128x4xbf16>
    %6 = vector.extract_strided_slice %4 {offsets = [1, 0], sizes = [128, 4], strides = [1, 1]} : vector<132x4xbf16> to vector<128x4xbf16>
    %7 = vector.extract_strided_slice %4 {offsets = [2, 0], sizes = [128, 4], strides = [1, 1]} : vector<132x4xbf16> to vector<128x4xbf16>
    %8 = vector.extract_strided_slice %4 {offsets = [3, 0], sizes = [128, 4], strides = [1, 1]} : vector<132x4xbf16> to vector<128x4xbf16>
    %9 = tpu.concatenate %5, %6, %7, %8 in 1 : vector<128x4xbf16>, vector<128x4xbf16>, vector<128x4xbf16>, vector<128x4xbf16> -> vector<128x16xbf16>
    %c0_6 = arith.constant 0 : index
    %c0_7 = arith.constant 0 : index
    %10 = vector.load %arg4[%c0_6, %c0_7] : memref<8x16xbf16, #tpu.memory_space<vmem>>, vector<8x16xbf16>
    %cst = arith.constant dense<0.000000e+00> : vector<8x128xf32>
    %11 = tpu.matmul %10, %9, %cst {dimension_numbers = #tpu.dot_dimension_numbers<[1], [1], [0], [0], [0, 0, 1, 0], [], []>} : vector<8x16xbf16>, vector<128x16xbf16>, vector<8x128xf32> -> vector<8x128xf32>
    %c0_8 = arith.constant 0 : index
    %c0_9 = arith.constant 0 : index
    %12 = vector.load %arg5[%c0_8, %c0_9] : memref<8x16xbf16, #tpu.memory_space<vmem>>, vector<8x16xbf16>
    %cst_10 = arith.constant dense<0.000000e+00> : vector<8x128xf32>
    %13 = tpu.matmul %12, %9, %cst_10 {dimension_numbers = #tpu.dot_dimension_numbers<[1], [1], [0], [0], [0, 0, 1, 0], [], []>} : vector<8x16xbf16>, vector<128x16xbf16>, vector<8x128xf32> -> vector<8x128xf32>
    %14 = arith.mulf %11, %11 : vector<8x128xf32>
    %15 = arith.mulf %13, %13 : vector<8x128xf32>
    %16 = arith.addf %14, %15 : vector<8x128xf32>
    %17 = vector.extract_strided_slice %14 {offsets = [0, 0], sizes = [1, 128], strides = [1, 1]} : vector<8x128xf32> to vector<1x128xf32>
    %18 = vector.extract_strided_slice %16 {offsets = [1, 0], sizes = [7, 128], strides = [1, 1]} : vector<8x128xf32> to vector<7x128xf32>
    %19 = vector.extract_strided_slice %15 {offsets = [0, 0], sizes = [1, 128], strides = [1, 1]} : vector<8x128xf32> to vector<1x128xf32>
    %20 = tpu.concatenate %17, %18, %19 in 0 : vector<1x128xf32>, vector<7x128xf32>, vector<1x128xf32> -> vector<9x128xf32>
    %c0_11 = arith.constant 0 : index
    %c0_12 = arith.constant 0 : index
    %c0_13 = arith.constant 0 : index
    %21 = vector.load %arg6[%c0_11, %c0_12, %c0_13] : memref<1x9x128xf32, #tpu.memory_space<vmem>>, vector<1x9x128xf32>
    %22 = vector.shape_cast %21 : vector<1x9x128xf32> to vector<9x128xf32>
    %23 = vector.shape_cast %20 : vector<9x128xf32> to vector<1x9x128xf32>
    tpu.vector_store %arg6[%c0_11, %c0_12, %c0_13], %23 {strides = array<i32>} : memref<1x9x128xf32, #tpu.memory_space<vmem>>, vector<1x9x128xf32>,
    return
  }
  func.func @transform_0(%arg0: i32, %arg1: i32) -> (i32, i32, i32) {
    %c0_i32 = arith.constant 0 : i32
    %c0_i32_0 = arith.constant 0 : i32
    return %arg0, %arg1, %c0_i32 : i32, i32, i32
  }
  func.func @transform_1(%arg0: i32, %arg1: i32) -> (i32, i32, i32, i32) {
    %c0_i32 = arith.constant 0 : i32
    %c0_i32_0 = arith.constant 0 : i32
    %c0_i32_1 = arith.constant 0 : i32
    return %arg0, %arg1, %c0_i32, %c0_i32_0 : i32, i32, i32, i32
  }
  func.func @transform_2(%arg0: i32, %arg1: i32) -> (i32, i32) {
    %c0_i32 = arith.constant 0 : i32
    %c0_i32_0 = arith.constant 0 : i32
    %c0_i32_1 = arith.constant 0 : i32
    return %c0_i32, %c0_i32_0 : i32, i32
  }
  func.func @transform_3(%arg0: i32, %arg1: i32) -> (i32, i32) {
    %c0_i32 = arith.constant 0 : i32
    %c0_i32_0 = arith.constant 0 : i32
    %c0_i32_1 = arith.constant 0 : i32
    return %c0_i32, %c0_i32_0 : i32, i32
  }
  func.func @transform_4(%arg0: i32, %arg1: i32) -> (i32, i32, i32) {
    %c0_i32 = arith.constant 0 : i32
    %c0_i32_0 = arith.constant 0 : i32
    return %arg0, %c0_i32, %arg1 : i32, i32, i32
  }
}

</mosaic_0001>

<bundles_post_ra>
// kernel: tpu_custom_call.1
= control target key start
LH: loop header
LB: loop body
LE: loop exit
PB: predicated region body
PF: predicated region fallthrough
CT: control target
= control target key end

     0   :  { %s947_s15 = smov 0   ;;  %s949_s16 = smov 0   ;;  %s1152_s0 = inlined_call_operand.vmem [shape: bf16[2,132,4], index: 0, kind: input, shape index: {}]   ;;  %s1153_s1 = inlined_call_operand.vmem [shape: bf16[2,1,4,4], index: 1, kind: input, shape index: {}]   ;;  %s1154_s2 = inlined_call_operand.vmem [shape: bf16[8,16], index: 2, kind: input, shape index: {}]   ;;  %s1155_s3 = inlined_call_operand.vmem [shape: bf16[8,16], index: 3, kind: input, shape index: {}]   ;;  %s1156_s4 = inlined_call_operand.vmem [shape: f32[2,9,128], index: 4, kind: output, shape index: {}]  }
   0x1   :  { %s951_s17 = smov 0  }
   0x2 LB: > { %s26_s18 = sadd.s32 1, %s911_s16  ;;  %p779_p0 = scmp.ge.s32.totalorder %s915_s17, 1  ;;  %s915_s17 = sphi %s951_s17, %s14_s17   ;;  %s911_s16 = sphi %s949_s16, %s1158_s16   ;;  %s907_s15 = sphi %s947_s15, %s1157_s15  }
   0x3   : > { %p28_p1 = scmp.ge.s32.totalorder %s26_s18, 2  ;;  %p205_p2 = scmp.lt.s32.totalorder %s915_s17, 3 }
   0x5   : > { %s1160_s18 = smov (%p28_p1, %s26_s18), 0  ;;  %p206_p3 = pnand %p779_p0, %p205_p2 }
   0x6   : > { %p254_p4 = scmp.lt.s32.totalorder (!%p206_p3), %s907_s15, 1  ;;  %vm340_vm0 = vsmask.f32 (!%p206_p3), 7424  ;;  %vm460_vm1 = vsmask.f32 (!%p206_p3), 6400  ;;  %vm426_vm2 = vcmask (!%p206_p3), 1046528  }
   0x7   : > { %209 = sbr.rel (%p206_p3) target bundleno = 429 (0x1ad), region = 36  ;;  %s917_s23 = smov (!%p206_p3), 4   ;;  %v920_v58 = vmov (!%p206_p3), 0.0   ;;  %vm921_vm3 = vmmov (!%p206_p3), 0   ;;  %vm514_vm4 = vcmask (!%p206_p3), 31744   ;;  %vm531_vm5 = vcmask (!%p206_p3), 64512  }
   0x8   : > { %s918_s24 = smov (!%p206_p3), 12   ;;  %s919_s25 = smov (!%p206_p3), 8   ;;  %815 = vmatprep.subr.bf16.mxu0 (!%p206_p3), %v920_v58  ;;  %835 = vmatprep.subr.bf16.mxu1 (!%p206_p3), %v920_v58  ;;  %vm548_vm6 = vcmask (!%p206_p3), 97280   ;;  %vm566_vm7 = vcmask (!%p206_p3), 130048   ;;  %vm673_vm8 = vcmask (!%p206_p3), 1040384  }
   0x9   : > { %831 = vmatprep.mubr.msk.bf16.mxu0 (!%p206_p3), %vm921_vm3, %v920_v58  ;;  %851 = vmatprep.mubr.msk.bf16.mxu1 (!%p206_p3), %vm921_vm3, %v920_v58 }
   0xe   : > { %s1162_s15 = smov (!%p254_p4, %s907_s15), 1 }
   0xf   : > { %s855_s19 = smul.u32 68, %s1162_s15  ;;  %s781_s26 = sshll.u32 %s1162_s15, 1 }
  0x10   : > { %s273_s29 = scalar_lea.vmem %s1153_s1, %s781_s26  ;;  %s796_s8 = sshll.u32 %s1162_s15, 4 }
  0x11   : > { %s971_s22 = scalar_lea.vmem %s1152_s0, %s855_s19  ;;  %s281_s11 = scalar_lea.vmem %s1156_s4, %s796_s8 }
  0x12   : > { %v974_v0 = vld [vmem:[%s971_s22] sm:$0xff]   ;;  %v977_v1 = vld [vmem:[%s971_s22 + $0x8] sm:$0xff]   ;;  %v980_v2 = vld [vmem:[%s971_s22 + $0x10] sm:$0xff]  }
  0x13   : > { %v342_v3 = vshrl.u32 %v974_v0, 16  ;;  %v344_v4 = vshll.u32 %v974_v0, 16  ;;  %v349_v5 = vshll.u32 %v977_v1, 16  ;;  %v353_v6 = vshrl.u32 %v977_v1, 16  ;;  %v990_v17 = vld [vmem:[%s971_s22 + $0x18] sm:$0xff]   ;;  %v1003_v33 = vld [vmem:[%s971_s22 + $0x20] sm:$0xff]  }
  0x14   : > { %v427_v7 = vrot.slane %v974_v0, 1  ;;  %v428_v8 = vrot.slane %v977_v1, 1  ;;  %v357_v9 = vshll.u32 %v980_v2, 16  ;;  %v361_v22 = vshrl.u32 %v980_v2, 16  ;;  %v1017_v46 = vld [vmem:[%s971_s22 + $0x28] sm:$0xff]   ;;  %v1027_v57 = vld [vmem:[%s971_s22 + $0x30] sm:$0xff]  }
  0x15   : > { %v346_v10 = vrot.slane %v344_v4, 1  ;;  %v351_v11 = vrot.slane %v349_v5, 1  ;;  %v461_v12 = vrot.slane %v342_v3, 1  ;;  %v462_v13 = vrot.slane %v344_v4, 2 }
  0x16   : > { %v464_v14 = vrot.slane %v353_v6, 1  ;;  %v465_v15 = vrot.slane %v349_v5, 2  ;;  %v359_v16 = vrot.slane %v357_v9, 1  ;;  %v469_v23 = vrot.slane %v357_v9, 2 }
  0x17   : > { %v347_v18 = vor.u32 %v346_v10, %v342_v3  ;;  %v463_v19 = vor.u32 %v462_v13, %v461_v12  ;;  %v355_v21 = vor.u32 %v353_v6, %v351_v11  ;;  %v430_v26 = vrot.slane %v980_v2, 1 }
  0x18   : > { %v466_v20 = vor.u32 %v465_v15, %v464_v14  ;;  %v468_v27 = vrot.slane %v361_v22, 1  ;;  %v429_v28 = vsel %vm426_vm2, %v427_v7, %v428_v8  ;;  %v365_v29 = vshll.u32 %v990_v17, 16  ;;  %v1040_v7 = vld [vmem:[%s971_s22 + $0x38] sm:$0xff]  }
  0x19   : > { %v352_v24 = vsel %vm340_vm0, %v347_v18, %v351_v11  ;;  %v369_v30 = vshrl.u32 %v990_v17, 16  ;;  %v360_v31 = vsel %vm340_vm0, %v355_v21, %v359_v16  ;;  %v431_v34 = vsel %vm426_vm2, %v428_v8, %v430_v26 }
  0x1a   : > { %409 = vrot.lane.b32.xlu0 %v352_v24, %s917_s23  ;;  %v467_v25 = vsel %vm460_vm1, %v463_v19, %v466_v20  ;;  %v470_v32 = vor.u32 %v469_v23, %v468_v27  ;;  %v432_v35 = vrot.slane %v990_v17, 1  ;;  %v363_v36 = vor.u32 %v361_v22, %v359_v16  ;;  %v299_v22 = vld [vmem:[%s273_s29] sm:$0x3] }
  0x1b   : > { %498 = vrot.lane.b32.xlu1 %v467_v25, %s918_s24  ;;  %v367_v37 = vrot.slane %v365_v29, 1  ;;  %v472_v38 = vrot.slane %v369_v30, 1  ;;  %v473_v39 = vrot.slane %v365_v29, 2  ;;  %v373_v41 = vshll.u32 %v1003_v33, 16 }
  0x1c   : > { %v471_v40 = vsel %vm460_vm1, %v466_v20, %v470_v32  ;;  %v377_v42 = vshrl.u32 %v1003_v33, 16  ;;  %v433_v44 = vsel %vm426_vm2, %v430_v26, %v432_v35  ;;  %v434_v51 = vrot.slane %v1003_v33, 1 }
  0x1d   : > { %v368_v43 = vsel %vm340_vm0, %v363_v36, %v367_v37  ;;  %v474_v45 = vor.u32 %v473_v39, %v472_v38  ;;  %v371_v47 = vor.u32 %v369_v30, %v367_v37  ;;  %v375_v48 = vrot.slane %v373_v41, 1 }
  0x1e   : > { %444 = vrot.lane.b32.xlu0 %v429_v28, %s919_s25  ;;  %v476_v49 = vrot.slane %v377_v42, 1  ;;  %v477_v50 = vrot.slane %v373_v41, 2  ;;  %v381_v53 = vshll.u32 %v1017_v46, 16  ;;  %v385_v54 = vshrl.u32 %v1017_v46, 16 }
  0x1f   : > { %411 = vrot.lane.b32.xlu1 %v360_v31, %s917_s23  ;;  %v475_v52 = vsel %vm460_vm1, %v470_v32, %v474_v45  ;;  %v376_v55 = vsel %vm340_vm0, %v371_v47, %v375_v48  ;;  %v435_v59 = vsel %vm426_vm2, %v432_v35, %v434_v51  ;;  %v436_v60 = vrot.slane %v1017_v46, 1 }
  0x20   : > { %v478_v56 = vor.u32 %v477_v50, %v476_v49  ;;  %v379_v61 = vor.u32 %v377_v42, %v375_v48  ;;  %v383_v62 = vrot.slane %v381_v53, 1  ;;  %v480_v63 = vrot.slane %v385_v54, 1 }
  0x21   : > { %v481_v3 = vrot.slane %v381_v53, 2  ;;  %v389_v5 = vshll.u32 %v1027_v57, 16  ;;  %v393_v6 = vshrl.u32 %v1027_v57, 16  ;;  %v437_v9 = vsel %vm426_vm2, %v434_v51, %v436_v60 }
  0x22   : > { %446 = vrot.lane.b32.xlu0 %v431_v34, %s919_s25  ;;  %v479_v4 = vsel %vm460_vm1, %v474_v45, %v478_v56  ;;  %v384_v8 = vsel %vm340_vm0, %v379_v61, %v383_v62  ;;  %v387_v11 = vor.u32 %v385_v54, %v383_v62  ;;  %v438_v15 = vrot.slane %v1027_v57, 1 }
  0x23   : > { %500 = vrot.lane.b32.xlu1 %v471_v40, %s918_s24  ;;  %v482_v10 = vor.u32 %v481_v3, %v480_v63  ;;  %v391_v12 = vrot.slane %v389_v5, 1  ;;  %v484_v13 = vrot.slane %v393_v6, 1  ;;  %v485_v14 = vrot.slane %v389_v5, 2 }
  0x24   : > { %v397_v16 = vshll.u32 %v1040_v7, 16  ;;  %v401_v19 = vshrl.u32 %v1040_v7, 16  ;;  %v439_v23 = vsel %vm426_vm2, %v436_v60, %v438_v15  ;;  %v440_v26 = vrot.slane %v1040_v7, 1 }
  0x25   : > { %v483_v18 = vsel %vm460_vm1, %v478_v56, %v482_v10  ;;  %v392_v20 = vsel %vm340_vm0, %v387_v11, %v391_v12  ;;  %v486_v21 = vor.u32 %v485_v14, %v484_v13  ;;  %v395_v25 = vor.u32 %v393_v6, %v391_v12 }
  0x26   : > { %413 = vrot.lane.b32.xlu0 %v368_v43, %s917_s23  ;;  %v399_v24 = vrot.slane %v397_v16, 1  ;;  %v488_v27 = vrot.slane %v401_v19, 1  ;;  %v489_v28 = vrot.slane %v397_v16, 2  ;;  %v405_v30 = vshll.u32 %v299_v22, 16 }
  0x27   : > { %448 = vrot.lane.b32.xlu1 %v433_v44, %s919_s25  ;;  %v487_v29 = vsel %vm460_vm1, %v482_v10, %v486_v21  ;;  %v492_v31 = vshrl.u32 %v299_v22, 16  ;;  %v441_v34 = vsel %vm426_vm2, %v438_v15, %v440_v26  ;;  %v442_v41 = vrot.slane %v299_v22, 1 }
  0x28   : > { %v400_v32 = vsel %vm340_vm0, %v395_v25, %v399_v24  ;;  %v490_v35 = vor.u32 %v489_v28, %v488_v27  ;;  %v403_v36 = vor.u32 %v401_v19, %v399_v24  ;;  %v407_v37 = vrot.slane %v405_v30, 1 }
  0x29   : > { %v494_v38 = vrot.slane %v492_v31, 1  ;;  %v495_v39 = vrot.slane %v405_v30, 2  ;;  %v443_v44 = vsel %vm426_vm2, %v440_v26, %v442_v41 }
  0x2a   : > { %502 = vrot.lane.b32.xlu0 %v475_v52, %s918_s24  ;;  %v491_v40 = vsel %vm460_vm1, %v486_v21, %v490_v35  ;;  %v408_v42 = vsel %vm340_vm0, %v403_v36, %v407_v37 }
  0x2b   : > { %415 = vrot.lane.b32.xlu1 %v376_v55, %s917_s23  ;;  %v496_v43 = vor.u32 %v495_v39, %v494_v38 }
  0x2d   : > { %v497_v45 = vsel %vm460_vm1, %v490_v35, %v496_v43 }
  0x2e   : > { %450 = vrot.lane.b32.xlu0 %v435_v59, %s919_s25 }
  0x2f   : > { %504 = vrot.lane.b32.xlu1 %v479_v4, %s918_s24 }
  0x32   : > { %417 = vrot.lane.b32.xlu0 %v384_v8, %s917_s23 }
  0x33   : > { %452 = vrot.lane.b32.xlu1 %v437_v9, %s919_s25 }
  0x36   : > { %506 = vrot.lane.b32.xlu0 %v483_v18, %s918_s24 }
  0x37   : > { %419 = vrot.lane.b32.xlu1 %v392_v20, %s917_s23 }
  0x3a   : > { %454 = vrot.lane.b32.xlu0 %v439_v23, %s919_s25 }
  0x3b   : > { %508 = vrot.lane.b32.xlu1 %v487_v29, %s918_s24 }
  0x3e   : > { %421 = vrot.lane.b32.xlu0 %v400_v32, %s917_s23 }
  0x3f   : > { %456 = vrot.lane.b32.xlu1 %v441_v34, %s919_s25 }
  0x42   : > { %510 = vrot.lane.b32.xlu0 %v491_v40, %s918_s24  ;;  %v626_v40 = vld [vmem:[%s1155_s3] sm:$0xf] }
  0x43   : > { %423 = vrot.lane.b32.xlu1 %v408_v42, %s917_s23 }
  0x46   : > { %458 = vrot.lane.b32.xlu0 %v443_v44, %s919_s25 }
  0x47   : > { %512 = vrot.lane.b32.xlu1 %v497_v45, %s918_s24 }
  0x8c   : > { %v410_v47 = vpop.permute.xlu0 %409 }
  0x8d   : > { %v499_v48 = vpop.permute.xlu1 %498  ;;  %v516_v49 = vsel %vm514_vm4, %v974_v0, %v410_v47 }
  0x90   : > { %v445_v50 = vpop.permute.xlu0 %444 }
  0x91   : > { %v533_v51 = vsel %vm531_vm5, %v516_v49, %v445_v50  ;;  %v412_v52 = vpop.permute.xlu1 %411 }
  0x92   : > { %v518_v53 = vsel %vm514_vm4, %v977_v1, %v412_v52  ;;  %v550_v54 = vsel %vm548_vm6, %v533_v51, %v499_v48 }
  0x93   : > { %v570_v55 = vsel %vm566_vm7, %v550_v54, 0 }
  0x94   : > { %816 = vmatpush3.bf16.xpose.msra.mxu0 %v570_v55  ;;  %836 = vmatpush3.bf16.xpose.msra.mxu1 %v570_v55  ;;  %v447_v56 = vpop.permute.xlu0 %446 }
  0x95   : > { %v535_v59 = vsel %vm531_vm5, %v518_v53, %v447_v56  ;;  %v501_v60 = vpop.permute.xlu1 %500  ;;  %817 = vmatprep.subr.bf16.mxu0 %v920_v58  ;;  %837 = vmatprep.subr.bf16.mxu1 %v920_v58 }
  0x96   : > { %v552_v0 = vsel %vm548_vm6, %v535_v59, %v501_v60 }
  0x97   : > { %v572_v63 = vsel %vm566_vm7, %v552_v0, 0 }
  0x98   : > { %v414_v61 = vpop.permute.xlu0 %413 }
  0x99   : > { %v449_v62 = vpop.permute.xlu1 %448  ;;  %v520_v1 = vsel %vm514_vm4, %v980_v2, %v414_v61 }
  0x9a   : > { %v537_v3 = vsel %vm531_vm5, %v520_v1, %v449_v62 }
  0x9c   : > { %818 = vmatpush3.bf16.xpose.msra.mxu0 %v572_v63  ;;  %838 = vmatpush3.bf16.xpose.msra.mxu1 %v572_v63  ;;  %v503_v4 = vpop.permute.xlu0 %502 }
  0x9d   : > { %819 = vmatprep.subr.bf16.mxu0 %v920_v58  ;;  %839 = vmatprep.subr.bf16.mxu1 %v920_v58  ;;  %v416_v5 = vpop.permute.xlu1 %415  ;;  %v554_v6 = vsel %vm548_vm6, %v537_v3, %v503_v4 }
  0x9e   : > { %v522_v9 = vsel %vm514_vm4, %v990_v17, %v416_v5  ;;  %v574_v2 = vsel %vm566_vm7, %v554_v6, 0 }
  0xa0   : > { %v451_v8 = vpop.permute.xlu0 %450 }
  0xa1   : > { %v539_v10 = vsel %vm531_vm5, %v522_v9, %v451_v8  ;;  %v505_v11 = vpop.permute.xlu1 %504 }
  0xa2   : > { %v556_v13 = vsel %vm548_vm6, %v539_v10, %v505_v11 }
  0xa3   : > { %v576_v17 = vsel %vm566_vm7, %v556_v13, 0 }
  0xa4   : > { %820 = vmatpush3.bf16.xpose.msra.mxu0 %v574_v2  ;;  %840 = vmatpush3.bf16.xpose.msra.mxu1 %v574_v2  ;;  %v418_v12 = vpop.permute.xlu0 %417 }
  0xa5   : > { %821 = vmatprep.subr.bf16.mxu0 %v920_v58  ;;  %841 = vmatprep.subr.bf16.mxu1 %v920_v58  ;;  %v453_v14 = vpop.permute.xlu1 %452  ;;  %v524_v15 = vsel %vm514_vm4, %v1003_v33, %v418_v12 }
  0xa6   : > { %v541_v16 = vsel %vm531_vm5, %v524_v15, %v453_v14 }
  0xa8   : > { %v507_v18 = vpop.permute.xlu0 %506 }
  0xa9   : > { %v420_v19 = vpop.permute.xlu1 %419  ;;  %v558_v20 = vsel %vm548_vm6, %v541_v16, %v507_v18 }
  0xaa   : > { %v526_v22 = vsel %vm514_vm4, %v1017_v46, %v420_v19  ;;  %v578_v33 = vsel %vm566_vm7, %v558_v20, 0 }
  0xac   : > { %822 = vmatpush3.bf16.xpose.msra.mxu0 %v576_v17  ;;  %842 = vmatpush3.bf16.xpose.msra.mxu1 %v576_v17  ;;  %v455_v21 = vpop.permute.xlu0 %454 }
  0xad   : > { %823 = vmatprep.subr.bf16.mxu0 %v920_v58  ;;  %843 = vmatprep.subr.bf16.mxu1 %v920_v58  ;;  %v543_v23 = vsel %vm531_vm5, %v526_v22, %v455_v21  ;;  %v509_v24 = vpop.permute.xlu1 %508 }
  0xae   : > { %v560_v26 = vsel %vm548_vm6, %v543_v23, %v509_v24 }
  0xaf   : > { %v580_v46 = vsel %vm566_vm7, %v560_v26, 0 }
  0xb0   : > { %v422_v25 = vpop.permute.xlu0 %421 }
  0xb1   : > { %v457_v27 = vpop.permute.xlu1 %456  ;;  %v528_v28 = vsel %vm514_vm4, %v1027_v57, %v422_v25 }
  0xb2   : > { %v545_v29 = vsel %vm531_vm5, %v528_v28, %v457_v27 }
  0xb4   : > { %824 = vmatpush3.bf16.xpose.msra.mxu0 %v578_v33  ;;  %844 = vmatpush3.bf16.xpose.msra.mxu1 %v578_v33  ;;  %v511_v30 = vpop.permute.xlu0 %510 }
  0xb5   : > { %825 = vmatprep.subr.bf16.mxu0 %v920_v58  ;;  %845 = vmatprep.subr.bf16.mxu1 %v920_v58  ;;  %v424_v31 = vpop.permute.xlu1 %423  ;;  %v562_v32 = vsel %vm548_vm6, %v545_v29, %v511_v30 }
  0xb6   : > { %v530_v34 = vsel %vm514_vm4, %v1040_v7, %v424_v31  ;;  %v582_v57 = vsel %vm566_vm7, %v562_v32, 0  ;;  %v565_v7 = vld [vmem:[%s1154_s2] sm:$0xf] }
  0xb8   : > { %v459_v35 = vpop.permute.xlu0 %458 }
  0xb9   : > { %v547_v36 = vsel %vm531_vm5, %v530_v34, %v459_v35  ;;  %v513_v37 = vpop.permute.xlu1 %512 }
  0xba   : > { %v564_v38 = vsel %vm548_vm6, %v547_v36, %v513_v37 }
  0xbb   : > { %v584_v39 = vsel %vm566_vm7, %v564_v38, 0 }
  0xbc   : > { %826 = vmatpush3.bf16.xpose.msra.mxu0 %v580_v46  ;;  %846 = vmatpush3.bf16.xpose.msra.mxu1 %v580_v46 }
  0xbd   : > { %827 = vmatprep.subr.bf16.mxu0 %v920_v58  ;;  %847 = vmatprep.subr.bf16.mxu1 %v920_v58 }
  0xc4   : > { %828 = vmatpush3.bf16.xpose.msra.mxu0 %v582_v57  ;;  %848 = vmatpush3.bf16.xpose.msra.mxu1 %v582_v57 }
  0xc5   : > { %829 = vmatprep.subr.bf16.mxu0 %v920_v58  ;;  %849 = vmatprep.subr.bf16.mxu1 %v920_v58 }
  0xcc   : > { %830 = vmatpush3.bf16.xpose.msra.mxu0 %v584_v39  ;;  %850 = vmatpush3.bf16.xpose.msra.mxu1 %v584_v39 }
  0xd3   : > { %832 = vmatmul.mubr.msk.bf16.vlgmr.msra.gmra.mrb[0].mxu0 %vm566_vm7, %v565_v7  ;;  %852 = vmatmul.mubr.msk.bf16.vlgmr.msra.gmra.mrb[0].mxu1 %vm566_vm7, %v626_v40 }
 0x1a6   : > { %v620_v58 = vpop.f32.mrb[0].mxu0  ;;  %v664_v41 = vpop.f32.mrb[0].mxu1 }
 0x1a7   : > { %v670_v42 = vmul.f32 %v620_v58, %v620_v58  ;;  %v671_v43 = vmul.f32 %v664_v41, %v664_v41  ;;  %v833_v44 = vpop.f32.mrb[1].mxu0  ;;  %v853_v45 = vpop.f32.mrb[1].mxu1 }
 0x1a8   : > { %v623_v47 = vpop.f32.mrb[2].mxu0  ;;  %v667_v48 = vpop.f32.mrb[2].mxu1 }
 0x1a9   : > { %v672_v49 = vadd.f32 %v671_v43, %v670_v42  ;;  %676 = vst [vmem:[%s281_s11 + $0x8] sm:$0x1] %v671_v43  ;;  %v834_v50 = vpop.f32.mrb[3].mxu0  ;;  %v854_v51 = vpop.f32.mrb[3].mxu1 }
 0x1ab   : > { %v674_v52 = vsel %vm673_vm8, %v670_v42, %v672_v49 }
 0x1ac   : > { %675 = vst [vmem:[%s281_s11] sm:$0xff] %v674_v52 }
 0x1ad PF: > { %s14_s17 = sadd.s32 1, %s915_s17   ;;  %s1157_s15 = smov %s911_s16 }
 0x1ae   : > { %p11_p5 = scmp.ge.s32.totalorder %s14_s17, 4   ;;  %s1158_s16 = smov %s1160_s18 }
 0x1b0   :  { %13 = sbr.rel (!%p11_p5) target bundleno = 2 (0x2), region = 69 }

</bundles_post_ra>
